<compile_context>
chip_gen: v5e
topology: v5e:2x2
jax: 0.10.0
libtpu: 0.0.40
codegen_flags: <defaults>
</compile_context>

<pallas_src>
import functools

import jax
import jax.numpy as jnp
from jax.experimental import pallas as pl
from jax.experimental.pallas import tpu as pltpu


def _round_up(x, m):
    return ((x + m - 1) // m) * m


def adapter_kernel(obj_ref, bbox_ref, wo_obj_ref, w_comb_ref, b_comb_ref,
                   out_ref, abssum_ref):
    # One row-tile per grid step:
    #   obj_ref  : (TM, F_obj)   bbox_ref : (TM, F_bbox)
    #   wo_obj   : (F_obj, HID)  w_comb   : (F_bbox, HID)   b_comb : (1, HID) f32
    #   out_ref  : (TM, HID)     abssum   : (TM, 1) f32 (mask side output)
    obj = obj_ref[...]

    # Mask reduction from the tile already resident in VMEM (saves a second
    # full HBM pass over obj_feat in the wrapper).  f32 sum regardless of the
    # compute dtype of the tile.
    abssum_ref[...] = jnp.sum(jnp.abs(obj.astype(jnp.float32)), axis=-1,
                              keepdims=True)

    # Two independent MXU matmuls with f32 accumulation + f32 bias add.
    acc = (jnp.dot(obj, wo_obj_ref[...], preferred_element_type=jnp.float32)
           + jnp.dot(bbox_ref[...], w_comb_ref[...],
                     preferred_element_type=jnp.float32)
           + b_comb_ref[...])
    out_ref[...] = acc.astype(out_ref.dtype)


def adapter_forward(obj_feat, bbox_feat, params, *,
                    row_tile=512,
                    compute_dtype=jnp.bfloat16,
                    out_dtype=jnp.float32):
    """Returns (out (B, N, HID) out_dtype, obj_feat_mask (B, 1, 1, N) bool).

    row_tile:      rows of the flattened (B*N) axis per grid step.  512-1024 is
                   the sweet spot for this HBM-bound kernel; sweep on target HW.
    compute_dtype: MXU operand dtype for activations/weights.  bf16 (default)
                   halves input DMA bytes on v6e/v7x; accumulation and the bias
                   add stay f32.  Use f32 to match the module bit-for-bit.
                   (Ideally the producer emits bf16 so the cast below is free.)
    out_dtype:     output dtype (f32 matches the PyTorch module; bf16 halves
                   output DMA if downstream tolerates it).
    """
    obj_feat = obj_feat.astype(jnp.float32)
    bbox_feat = bbox_feat.astype(jnp.float32)
    B, N, F_obj = obj_feat.shape
    F_bbox = bbox_feat.shape[-1]
    wb, bb, wo_obj, wo_box, bo = params
    HID = wo_obj.shape[1]

    # Algebraic fusion of the bbox branch into the output projection (f32 fold,
    # then optional narrow cast for the MXU).
    w_comb = jnp.dot(wb, wo_box)                 # (F_bbox, HID)
    b_comb = (jnp.dot(bb, wo_box) + bo)          # (1, HID), stays f32

    # Flatten (B, N) -> rows.  No padding: the last (possibly partial) row
    # block is handled by Pallas boundary masking; garbage rows only ever feed
    # garbage output rows, and those stores are masked.
    R = B * N
    row_tile_eff = min(row_tile, _round_up(R, 8))   # keep sublane-aligned
    n_tiles = pl.cdiv(R, row_tile_eff)

    obj2 = obj_feat.reshape(R, F_obj).astype(compute_dtype)
    bbox2 = bbox_feat.reshape(R, F_bbox).astype(compute_dtype)
    wo_obj_in = wo_obj.astype(compute_dtype)
    w_comb_in = w_comb.astype(compute_dtype)
    b_comb_in = b_comb.astype(jnp.float32)

    # ---- VMEM budget (explicit; matters on v7x: 64 MiB phys / 32 MiB scoped).
    in_itemsize = jnp.dtype(compute_dtype).itemsize
    out_itemsize = jnp.dtype(out_dtype).itemsize
    block_bytes = (row_tile_eff * (F_obj + F_bbox) * in_itemsize   # inputs
                   + row_tile_eff * HID * out_itemsize             # out
                   + row_tile_eff * 4)                             # abssum
    weight_bytes = (F_obj * HID + F_bbox * HID) * in_itemsize + HID * 4
    footprint = 2 * block_bytes + 2 * weight_bytes                 # double-buffered
    vmem_limit = int(min(48 << 20, max(4 * footprint, 8 << 20)))

    flops = 2 * R * (F_obj + F_bbox) * HID
    bytes_accessed = int(
        obj2.size * in_itemsize + bbox2.size * in_itemsize
        + wo_obj_in.size * in_itemsize + w_comb_in.size * in_itemsize
        + b_comb_in.size * 4
        + R * HID * out_itemsize + R * 4)

    out_flat, abssum = pl.pallas_call(
        adapter_kernel,
        out_shape=(jax.ShapeDtypeStruct((R, HID), out_dtype),
                   jax.ShapeDtypeStruct((R, 1), jnp.float32)),
        grid_spec=pl.GridSpec(
            grid=(n_tiles,),
            in_specs=[
                pl.BlockSpec((row_tile_eff, F_obj), lambda i: (i, 0)),
                pl.BlockSpec((row_tile_eff, F_bbox), lambda i: (i, 0)),
                pl.BlockSpec((F_obj, HID), lambda i: (0, 0)),
                pl.BlockSpec((F_bbox, HID), lambda i: (0, 0)),
                pl.BlockSpec((1, HID), lambda i: (0, 0)),
            ],
            out_specs=(
                pl.BlockSpec((row_tile_eff, HID), lambda i: (i, 0)),
                pl.BlockSpec((row_tile_eff, 1), lambda i: (i, 0)),
            ),
        ),
        compiler_params=pltpu.CompilerParams(
            dimension_semantics=("parallel",),     # shards over v7x's 2 TCs
            vmem_limit_bytes=vmem_limit),
        cost_estimate=pl.CostEstimate(
            flops=flops, transcendentals=0, bytes_accessed=bytes_accessed),
    )(obj2, bbox2, wo_obj_in, w_comb_in, b_comb_in)

    out = out_flat.reshape(B, N, HID)
    obj_feat_mask = (abssum[:, 0].reshape(B, N) == 0.0)[:, None, None, :]
    return out, obj_feat_mask


def init_params(key, F_obj, F_bbox, EMB, HID):
    # weight_norm is a training-time reparameterization; at inference it is a
    # plain linear weight, so plain weights suffice here.
    k1, k2, k3, k4, k5 = jax.random.split(key, 5)
    wb = jax.random.normal(k1, (F_bbox, EMB), jnp.float32) * 0.05
    bb = jax.random.normal(k2, (1, EMB), jnp.float32) * 0.05
    wo_obj = jax.random.normal(k3, (F_obj, HID), jnp.float32) * 0.05
    wo_box = jax.random.normal(k4, (EMB, HID), jnp.float32) * 0.05
    bo = jax.random.normal(k5, (1, HID), jnp.float32) * 0.05
    return wb, bb, wo_obj, wo_box, bo


def reference_forward(obj_feat, bbox_feat, params):
    # Pure-JAX reference mirroring the PyTorch module (concat-then-linear).
    wb, bb, wo_obj, wo_box, bo = params
    obj_feat = obj_feat.astype(jnp.float32)
    bbox_feat = bbox_feat.astype(jnp.float32)
    mask = (jnp.sum(jnp.abs(obj_feat), axis=-1) == 0)[:, None, None, :]
    bbox_emb = bbox_feat @ wb + bb[0]
    cat = jnp.concatenate([obj_feat, bbox_emb], axis=-1)
    wo_full = jnp.concatenate([wo_obj, wo_box], axis=0)
    out = cat @ wo_full + bo[0]
    return out, mask


if __name__ == "__main__":
    # Small shapes consistent with the module:
    #   B=2, N=8 objects, OBJ_FEAT_SIZE=32, BBOX_FEAT_SIZE=8,
    #   BBOXFEAT_EMB_SIZE=16, HIDDEN_SIZE=32, USE_BBOX_FEAT=True
    B, N, F_obj, F_bbox, EMB, HID = 2, 8, 32, 8, 16, 32

    key = jax.random.PRNGKey(0)
    k_obj, k_bbox, k_param = jax.random.split(key, 3)

    obj_feat = jax.random.normal(k_obj, (B, N, F_obj), jnp.float32)
    # Zero a couple of object rows so the mask path is exercised.
    obj_feat = obj_feat.at[0, 3].set(0.0).at[1, 7].set(0.0)
    bbox_feat = jax.random.normal(k_bbox, (B, N, F_bbox), jnp.float32)

    params = init_params(k_param, F_obj, F_bbox, EMB, HID)
    ref_out, ref_mask = reference_forward(obj_feat, bbox_feat, params)

    # --- f32 compute path: bit-faithful to the module (tight tolerance). ---
    fwd_f32 = jax.jit(functools.partial(
        adapter_forward, row_tile=512, compute_dtype=jnp.float32))
    out32, mask32 = fwd_f32(obj_feat, bbox_feat, params)
    jax.block_until_ready(out32)
    jax.block_until_ready(mask32)
    assert out32.shape == (B, N, HID)
    assert mask32.shape == (B, 1, 1, N) and mask32.dtype == jnp.bool_
    assert jnp.allclose(out32, ref_out, atol=1e-5, rtol=1e-5)
    assert jnp.array_equal(mask32, ref_mask)

    # --- default bf16 compute path (half the input DMA bytes on v6e/v7x). ---
    fwd_bf16 = jax.jit(functools.partial(adapter_forward, row_tile=512))
    out16, mask16 = fwd_bf16(obj_feat, bbox_feat, params)
    jax.block_until_ready(out16)
    jax.block_until_ready(mask16)
    assert out16.shape == (B, N, HID) and out16.dtype == jnp.float32
    assert jnp.allclose(out16, ref_out, atol=3e-2, rtol=3e-2)
    assert jnp.array_equal(mask16, ref_mask)

    print("KERNEL_OK")
</pallas_src>

<mosaic_0001>
module attributes {stable_mosaic.version = 11 : i64} {
  func.func @adapter_kernel(%arg0: i32, %arg1: memref<16x32xf32, #tpu.memory_space<vmem>>, %arg2: memref<16x8xf32, #tpu.memory_space<vmem>>, %arg3: memref<32x32xf32, #tpu.memory_space<vmem>>, %arg4: memref<8x32xf32, #tpu.memory_space<vmem>>, %arg5: memref<1x32xf32, #tpu.memory_space<vmem>>, %arg6: memref<16x32xf32, #tpu.memory_space<vmem>>, %arg7: memref<16x1xf32, #tpu.memory_space<vmem>>) attributes {dimension_semantics = [#tpu.dimension_semantics<parallel>], iteration_bounds = array<i64: 1>, scalar_prefetch = 0 : i64, scratch_operands = 0 : i64, tpu.core_type = #tpu.core_type<tc>, window_params = [{transform_indices = @transform_0, window_bounds = array<i64: 16, 32>}, {transform_indices = @transform_1, window_bounds = array<i64: 16, 8>}, {pipeline_mode = #tpu.pipeline_mode<synchronous>, transform_indices = @transform_2, window_bounds = array<i64: 32, 32>}, {pipeline_mode = #tpu.pipeline_mode<synchronous>, transform_indices = @transform_3, window_bounds = array<i64: 8, 32>}, {pipeline_mode = #tpu.pipeline_mode<synchronous>, transform_indices = @transform_4, window_bounds = array<i64: 1, 32>}, {transform_indices = @transform_5, window_bounds = array<i64: 16, 32>}, {transform_indices = @transform_6, window_bounds = array<i64: 16, 1>}]} {
    %c0 = arith.constant 0 : index
    %c0_0 = arith.constant 0 : index
    %0 = vector.load %arg1[%c0, %c0_0] : memref<16x32xf32, #tpu.memory_space<vmem>>, vector<16x32xf32>
    %1 = math.absf %0 : vector<16x32xf32>
    %cst = arith.constant dense<0.000000e+00> : vector<16xf32>
    %2 = vector.multi_reduction <add>, %1, %cst [1] : vector<16x32xf32> to vector<16xf32>
    %3 = vector.shape_cast %2 : vector<16xf32> to vector<16x1xf32>
    %c0_1 = arith.constant 0 : index
    %c0_2 = arith.constant 0 : index
    %4 = vector.load %arg7[%c0_1, %c0_2] : memref<16x1xf32, #tpu.memory_space<vmem>>, vector<16x1xf32>
    tpu.vector_store %arg7[%c0_1, %c0_2], %3 {strides = array<i32>} : memref<16x1xf32, #tpu.memory_space<vmem>>, vector<16x1xf32>,
    %c0_3 = arith.constant 0 : index
    %c0_4 = arith.constant 0 : index
    %5 = vector.load %arg3[%c0_3, %c0_4] : memref<32x32xf32, #tpu.memory_space<vmem>>, vector<32x32xf32>
    %cst_5 = arith.constant dense<0.000000e+00> : vector<16x32xf32>
    %6 = tpu.matmul %0, %5, %cst_5 {dimension_numbers = #tpu.dot_dimension_numbers<[1], [0], [0], [1], [0, 0, 1, 1], [], []>} : vector<16x32xf32>, vector<32x32xf32>, vector<16x32xf32> -> vector<16x32xf32>
    %c0_6 = arith.constant 0 : index
    %c0_7 = arith.constant 0 : index
    %7 = vector.load %arg2[%c0_6, %c0_7] : memref<16x8xf32, #tpu.memory_space<vmem>>, vector<16x8xf32>
    %c0_8 = arith.constant 0 : index
    %c0_9 = arith.constant 0 : index
    %8 = vector.load %arg4[%c0_8, %c0_9] : memref<8x32xf32, #tpu.memory_space<vmem>>, vector<8x32xf32>
    %cst_10 = arith.constant dense<0.000000e+00> : vector<16x32xf32>
    %9 = tpu.matmul %7, %8, %cst_10 {dimension_numbers = #tpu.dot_dimension_numbers<[1], [0], [0], [1], [0, 0, 1, 1], [], []>} : vector<16x8xf32>, vector<8x32xf32>, vector<16x32xf32> -> vector<16x32xf32>
    %10 = arith.addf %6, %9 : vector<16x32xf32>
    %c0_11 = arith.constant 0 : index
    %c0_12 = arith.constant 0 : index
    %11 = vector.load %arg5[%c0_11, %c0_12] : memref<1x32xf32, #tpu.memory_space<vmem>>, vector<1x32xf32>
    %12 = vector.broadcast %11 : vector<1x32xf32> to vector<16x32xf32>
    %13 = arith.addf %10, %12 : vector<16x32xf32>
    %c0_13 = arith.constant 0 : index
    %c0_14 = arith.constant 0 : index
    %14 = vector.load %arg6[%c0_13, %c0_14] : memref<16x32xf32, #tpu.memory_space<vmem>>, vector<16x32xf32>
    tpu.vector_store %arg6[%c0_13, %c0_14], %13 {strides = array<i32>} : memref<16x32xf32, #tpu.memory_space<vmem>>, vector<16x32xf32>,
    return
  }
  func.func @transform_0(%arg0: i32) -> (i32, i32) {
    %c0_i32 = arith.constant 0 : i32
    %c0_i32_0 = arith.constant 0 : i32
    return %arg0, %c0_i32 : i32, i32
  }
  func.func @transform_1(%arg0: i32) -> (i32, i32) {
    %c0_i32 = arith.constant 0 : i32
    %c0_i32_0 = arith.constant 0 : i32
    return %arg0, %c0_i32 : i32, i32
  }
  func.func @transform_2(%arg0: i32) -> (i32, i32) {
    %c0_i32 = arith.constant 0 : i32
    %c0_i32_0 = arith.constant 0 : i32
    %c0_i32_1 = arith.constant 0 : i32
    return %c0_i32, %c0_i32_0 : i32, i32
  }
  func.func @transform_3(%arg0: i32) -> (i32, i32) {
    %c0_i32 = arith.constant 0 : i32
    %c0_i32_0 = arith.constant 0 : i32
    %c0_i32_1 = arith.constant 0 : i32
    return %c0_i32, %c0_i32_0 : i32, i32
  }
  func.func @transform_4(%arg0: i32) -> (i32, i32) {
    %c0_i32 = arith.constant 0 : i32
    %c0_i32_0 = arith.constant 0 : i32
    %c0_i32_1 = arith.constant 0 : i32
    return %c0_i32, %c0_i32_0 : i32, i32
  }
  func.func @transform_5(%arg0: i32) -> (i32, i32) {
    %c0_i32 = arith.constant 0 : i32
    %c0_i32_0 = arith.constant 0 : i32
    return %arg0, %c0_i32 : i32, i32
  }
  func.func @transform_6(%arg0: i32) -> (i32, i32) {
    %c0_i32 = arith.constant 0 : i32
    %c0_i32_0 = arith.constant 0 : i32
    return %arg0, %c0_i32 : i32, i32
  }
}

</mosaic_0001>

<bundles_post_ra>
// kernel: adapter_forward.1
= control target key start
LH: loop header
LB: loop body
LE: loop exit
PB: predicated region body
PF: predicated region fallthrough
CT: control target
= control target key end

     0   :  { %12 = vsyncpa [#allocation3], 0  ;;  %s350_s0 = inlined_call_operand.hbm [shape: f32[16,32], index: 0, kind: input, shape index: {}]   ;;  %s351_s1 = inlined_call_operand.hbm [shape: f32[16,8], index: 1, kind: input, shape index: {}]   ;;  %s352_s2 = inlined_call_operand.vmem [shape: f32[32,32], index: 2, kind: input, shape index: {}]   ;;  %s353_s3 = inlined_call_operand.vmem [shape: f32[8,32], index: 3, kind: input, shape index: {}]   ;;  %s354_s4 = inlined_call_operand.vmem [shape: f32[1,32], index: 4, kind: input, shape index: {}]   ;;  %s355_s5 = inlined_call_operand.hbm [shape: f32[16,32], index: 5, kind: output, shape index: {0}]   ;;  %s356_s6 = inlined_call_operand.vmem [shape: f32[16,1], index: 6, kind: output, shape index: {1}]  }
   0x1   :  { %13 = vsyncpa [#allocation6], 0 }
   0x2   :  { %14 = vsyncpa [#allocation4], 0  ;;  %s19_s23 = sshll.u32 %s350_s0, 4  ;;  %s260_s24 = smov [#allocation2]   ;;  %s20_s23 = int_to_ptr.hbm [resolvable:$true] %s19_s23 }
   0x3   :  { %s21_s25 = sshll.u32 %s260_s24, 4  ;;  %s32_s28 = sshll.u32 %s351_s1, 4  ;;  %s22_s25 = int_to_ptr.vmem [resolvable:$true] %s21_s25  ;;  %s33_s28 = int_to_ptr.hbm [resolvable:$true] %s32_s28 }
   0x4   :  { %s261_s29 = smov 128   ;;  %s262_s30 = smov 8  }
   0x5   :  { %27 = dma.hbm_to_vmem [thread:$0]  %s20_s23, 256, %s22_s25, [#allocation3], %s261_s29, %s261_s29, %s262_s30  }
   0x6   :  { %s263_s7 = smov [#allocation5]  }
   0x7   :  { %s34_s8 = sshll.u32 %s263_s7, 4  ;;  %s35_s8 = int_to_ptr.vmem [resolvable:$true] %s34_s8 }
   0x8   :  { %40 = dma.hbm_to_vmem [thread:$0]  %s33_s28, 256, %s35_s8, [#allocation6], %s261_s29, %s261_s29, %s262_s30  }
   0x9   :  { %254 = dma.done.wait [#allocation3], 256  }
   0xa   :  { %255 = vsyncadd [#allocation3], 4294967040 }
   0xb   :  { %256 = dma.done.wait [#allocation6], 256  }
   0xc   :  { %257 = vsyncadd [#allocation6], 4294967040  ;;  %v72_v0 = vld [vmem:[%s352_s2 + $0x18] sm:$0xff]  ;;  %v71_v1 = vld [vmem:[%s352_s2 + $0x10] sm:$0xff]  ;;  %vm76_vm0 = vcmask 64512   ;;  %vm59_vm1 = vcmask 261120  }
   0xd   :  { %172 = vmatpush.msra.mxu2 %v72_v0  ;;  %v75_v2 = vld [vmem:[%s353_s3] sm:$0xff]  ;;  %124 = vmatpush.msra.mxu1 %v72_v0  ;;  %v74_v3 = vld [vmem:[#allocation5 + $0x8] sm:$0xff]  ;;  %v70_v4 = vld [vmem:[%s352_s2 + $0x8] sm:$0xff]  ;;  %vm66_vm2 = vcmask 7168   ;;  %s264_s21 = smov [#allocation7]   ;;  %s149_s25 = sshll.u32 %s355_s5, 4  ;;  %s150_s25 = int_to_ptr.hbm [resolvable:$true] %s149_s25 }
   0xe   :  { %171 = vmatpush.msra.mxu3 %v75_v2  ;;  %98 = vmatpush.msra.mxu0 %v75_v2  ;;  %v73_v5 = vld [vmem:[#allocation5] sm:$0xff]  ;;  %v55_v6 = vld [vmem:[#allocation2] sm:$0xff]  ;;  %v56_v9 = vld [vmem:[#allocation2 + $0x8] sm:$0xff]  ;;  %s147_s22 = sshll.u32 %s264_s21, 4  ;;  %s148_s22 = int_to_ptr.vmem [resolvable:$true] %s147_s22 }
   0xf   :  { %173 = vmatpush.msra.mxu2 %v71_v1  ;;  %168 = vmatmul.msk.f32.vlgmr.msra.gmra.mxu3 %vm76_vm0, %v74_v3  ;;  %v57_v7 = vand.u32 2147483647, %v55_v6  ;;  %v69_v8 = vld [vmem:[%s352_s2] sm:$0xff]  ;;  %v58_v11 = vand.u32 2147483647, %v56_v9 }
  0x10   :  { %125 = vmatpush.msra.mxu1 %v71_v1  ;;  %167 = vmatmul.msk.f32.vlgmr.msra.gmra.mxu0 %vm76_vm0, %v73_v5  ;;  %v181_v16 = vld [vmem:[%s354_s4] ss:$0 sm:$0xff] }
  0x11   :  { %174 = vmatpush.msra.mxu2 %v70_v4  ;;  %v60_v10 = vsel %vm59_vm1, %v57_v7, 0.0  ;;  %v63_v12 = vsel %vm59_vm1, %v58_v11, 0.0 }
  0x12   :  { %126 = vmatpush.msra.mxu1 %v70_v4  ;;  %61 = vadd.xlane.f32.xlu0 %v60_v10 }
  0x13   :  { %175 = vmatpush.msra.mxu2 %v69_v8 }
  0x14   :  { %170 = vmatmul.msk.f32.vlgmr.msra.gmra.mxu2 %vm59_vm1, %v56_v9  ;;  %127 = vmatpush.msra.mxu1 %v69_v8 }
  0x15   :  { %169 = vmatmul.msk.f32.vlgmr.msra.gmra.mxu1 %vm59_vm1, %v55_v6 }
  0x1a   :  { %64 = vadd.xlane.f32.xlu0 %v63_v12 }
  0x85   :  { %v62_v13 = vpop.xlane.xlu0 %61 }
  0x86   :  { %67 = vst.msk [vmem:[%s356_s6] sm:$0xff] %vm66_vm2, %v62_v13 }
  0x8d   :  { %v65_v14 = vpop.xlane.xlu0 %64  ;;  %v100_v15 = vpop.f32.mrf.mxu0 }
  0x8e   :  { %68 = vst.msk [vmem:[%s356_s6 + $0x8] sm:$0xff] %vm66_vm2, %v65_v14 }
  0x92   :  { %v129_v17 = vpop.f32.mrf.mxu1  ;;  %v103_v19 = vpop.f32.mrf.mxu3 }
  0x93   :  { %v130_v18 = vadd.f32 %v129_v17, %v100_v15 }
  0x95   :  { %v139_v20 = vadd.f32 %v181_v16, %v130_v18 }
  0x97   :  { %141 = vst.msk [vmem:[#allocation7] sm:$0xff] %vm59_vm1, %v139_v20  ;;  %v132_v21 = vpop.f32.mrf.mxu2 }
  0x98   :  { %v133_v22 = vadd.f32 %v132_v21, %v103_v19 }
  0x9a   :  { %v140_v23 = vadd.f32 %v181_v16, %v133_v22 }
  0x9c   :  { %142 = vst.msk [vmem:[#allocation7 + $0x8] sm:$0xff] %vm59_vm1, %v140_v23 }
  0x9d   :  { %155 = dma.vmem_to_hbm [thread:$0]  %s148_s22, 256, %s150_s25, [#allocation4], %s261_s29, %s261_s29, %s262_s30  }
  0x9e   :  { %258 = dma.done.wait [#allocation4], 256  }
  0x9f   :  { %259 = vsyncadd [#allocation4], 4294967040 }
  0xa0   :  { %164 = vsyncpa [#allocation3], 1 }
  0xa1   :  { %165 = vsyncpa [#allocation6], 1 }
  0xa2   :  { %166 = vsyncpa [#allocation4], 1 }

</bundles_post_ra>
